<compile_context>
chip_gen: v5e
topology: v5e:2x2
jax: 0.10.0
libtpu: 0.0.40
codegen_flags: <defaults>
</compile_context>

<pallas_src>
import jax
import jax.numpy as jnp
from jax.experimental import pallas as pl
from jax.experimental.pallas import tpu as pltpu

_LANE = 128
_SUBLANE = 8


def _round_up(n, m):
    return ((n + m - 1) // m) * m


def mlp_kernel(x_ref, w1_ref, b1_ref, w2_ref, b2_ref, w3_ref, b3_ref, o_ref):
    # x tile: (TB, in_dims) f32; all weights/biases resident in VMEM across grid steps.
    h1 = jnp.dot(x_ref[...], w1_ref[...], preferred_element_type=jnp.float32)
    h1 = jnp.maximum(h1 + b1_ref[...], 0.0)                      # (TB, 32)
    h2 = jnp.dot(h1, w2_ref[...], preferred_element_type=jnp.float32)
    h2 = jnp.maximum(h2 + b2_ref[...], 0.0)                      # (TB, 32)
    # Final layer (32 -> 1): contract the hidden dim against the (1, 32) weight row,
    # producing a lane-dense (1, TB) slab (avoids 1-lane masked column stores).
    out_row = jax.lax.dot_general(
        w3_ref[...], h2,
        dimension_numbers=(((1,), (1,)), ((), ())),
        preferred_element_type=jnp.float32)                      # (1, TB)
    o_ref[...] = (out_row + b3_ref[...]).astype(o_ref.dtype)


def neural_network_forward(x, w1, b1, w2, b2, w3, b3, *,
                           vmem_budget_bytes=32 * 1024 * 1024,
                           max_tb=8192):
    """Forward pass.

    x:  (B, in_dims) f32
    w1: (in_dims, 32), b1: (1, 32)    -- stored (in, out): y = x @ w1 + b1
    w2: (32, 32),      b2: (1, 32)
    w3: (1, 32),       b3: (1, 1)     -- PyTorch-native (out, in) layout
    Returns (B, 1) f32.
    """
    B, in_dims = x.shape
    hidden = w1.shape[1]

    # ---- Batch-tile sizing from an explicit VMEM budget (safe on v5e/v6e/v7x) ----
    lanes_in = _round_up(max(in_dims, 1), _LANE)                 # x pads to 128 lanes
    # Pinned params: lane/sublane padded, assume 2 buffers each (worst case).
    param_rows = (_round_up(in_dims, _SUBLANE) + _round_up(hidden, _SUBLANE)
                  + 4 * _SUBLANE)                                # w1 + w2 + biases/w3
    param_bytes = 2 * param_rows * _LANE * 4
    avail = max(vmem_budget_bytes - param_bytes, 4 * 1024 * 1024)
    # Per batch-row cost: double-buffered x tile + generous slack for h1/h2/out tiles.
    per_row_bytes = (2 * lanes_in + 8 * _LANE) * 4
    tb = max(_LANE, min(max_tb, avail // per_row_bytes))
    tb = (tb // _LANE) * _LANE                                   # lane-dense output slab
    # Don't make the tile (much) larger than the batch itself.
    tb = min(tb, _round_up(max(B, 1), _LANE))
    # Keep >= 2 grid steps on larger batches so v7x megacore uses both TensorCores.
    if B > 2 * _LANE:
        tb = min(tb, _round_up(pl.cdiv(B, 2), _LANE))
    tb = max(tb, _LANE)

    num_tiles = pl.cdiv(B, tb)                                   # partial edge block OK

    # Advisory cost estimate for XLA scheduling around the custom call.
    param_count = (in_dims * hidden + hidden) + (hidden * hidden + hidden) + (hidden + 1)
    cost = pl.CostEstimate(
        flops=2 * B * (in_dims * hidden + hidden * hidden + hidden),
        transcendentals=0,
        bytes_accessed=4 * (B * in_dims + B + param_count))

    # Raise the scoped-VMEM limit above the tile budget; cap at 64 MiB (v7x physical).
    vmem_limit = int(min(vmem_budget_bytes + 16 * 1024 * 1024, 64 * 1024 * 1024))

    out = pl.pallas_call(
        mlp_kernel,
        out_shape=jax.ShapeDtypeStruct((1, B), jnp.float32),
        grid=(num_tiles,),
        in_specs=[
            pl.BlockSpec((tb, in_dims), lambda i: (i, 0)),   # stream x by batch tile
            pl.BlockSpec(w1.shape, lambda i: (0, 0)),        # weights/biases pinned
            pl.BlockSpec(b1.shape, lambda i: (0, 0)),
            pl.BlockSpec(w2.shape, lambda i: (0, 0)),
            pl.BlockSpec(b2.shape, lambda i: (0, 0)),
            pl.BlockSpec(w3.shape, lambda i: (0, 0)),
            pl.BlockSpec(b3.shape, lambda i: (0, 0)),
        ],
        out_specs=pl.BlockSpec((1, tb), lambda i: (0, i)),   # lane-dense output slab
        compiler_params=pltpu.CompilerParams(
            dimension_semantics=("parallel",),               # megacore on v7x
            vmem_limit_bytes=vmem_limit),
        cost_estimate=cost,
    )(x, w1, b1, w2, b2, w3, b3)

    # (1, B) lane-dense slab -> (B, 1) column (row-major reshape, no copy semantics change).
    return out.reshape(B, 1)


def init_params(key, in_dims, hidden=32):
    """Deterministic synthetic init (uniform, PyTorch-Linear-like bounds)."""
    ks = jax.random.split(key, 6)

    def lin(kw, kb, fan_in, fan_out, store_in_out):
        bound = 1.0 / jnp.sqrt(fan_in)
        shape = (fan_in, fan_out) if store_in_out else (fan_out, fan_in)
        w = jax.random.uniform(kw, shape, jnp.float32, -bound, bound)
        b = jax.random.uniform(kb, (1, fan_out), jnp.float32, -bound, bound)
        return w, b

    w1, b1 = lin(ks[0], ks[1], in_dims, hidden, True)   # (in, 32), (1, 32)
    w2, b2 = lin(ks[2], ks[3], hidden, hidden, True)    # (32, 32), (1, 32)
    w3, b3 = lin(ks[4], ks[5], hidden, 1, False)        # (1, 32),  (1, 1)
    return w1, b1, w2, b2, w3, b3


if __name__ == "__main__":
    key = jax.random.PRNGKey(0)
    kx, kx2, kp = jax.random.split(key, 3)

    in_dims = 16
    params = init_params(kp, in_dims)
    w1, b1, w2, b2, w3, b3 = params

    hi = jax.lax.Precision.HIGHEST

    def ref_fwd(xx):
        h = jnp.maximum(jnp.dot(xx, w1, precision=hi) + b1, 0.0)
        h = jnp.maximum(jnp.dot(h, w2, precision=hi) + b2, 0.0)
        return jnp.dot(h, w3.T, precision=hi) + b3

    # Small batch (single, partially-filled tile).
    x = jax.random.normal(kx, (8, in_dims), dtype=jnp.float32)
    out = jax.block_until_ready(neural_network_forward(x, *params))
    assert out.shape == (8, 1)
    assert jnp.allclose(out, ref_fwd(x), atol=1e-4, rtol=1e-4)

    # Unaligned multi-tile batch (exercises cdiv grid + masked partial edge block,
    # no host-side padding pass).
    x2 = jax.random.normal(kx2, (300, in_dims), dtype=jnp.float32)
    out2 = jax.block_until_ready(neural_network_forward(x2, *params))
    assert out2.shape == (300, 1)
    assert jnp.allclose(out2, ref_fwd(x2), atol=1e-4, rtol=1e-4)

    print("KERNEL_OK")
</pallas_src>

<mosaic_0001>
module attributes {stable_mosaic.version = 11 : i64} {
  func.func @mlp_kernel(%arg0: i32, %arg1: memref<128x16xf32, #tpu.memory_space<vmem>>, %arg2: memref<16x32xf32, #tpu.memory_space<vmem>>, %arg3: memref<1x32xf32, #tpu.memory_space<vmem>>, %arg4: memref<32x32xf32, #tpu.memory_space<vmem>>, %arg5: memref<1x32xf32, #tpu.memory_space<vmem>>, %arg6: memref<1x32xf32, #tpu.memory_space<vmem>>, %arg7: memref<1x1xf32, #tpu.memory_space<vmem>>, %arg8: memref<1x128xf32, #tpu.memory_space<vmem>>) attributes {dimension_semantics = [#tpu.dimension_semantics<parallel>], iteration_bounds = array<i64: 1>, scalar_prefetch = 0 : i64, scratch_operands = 0 : i64, tpu.core_type = #tpu.core_type<tc>, window_params = [{transform_indices = @transform_0, window_bounds = array<i64: 128, 16>}, {pipeline_mode = #tpu.pipeline_mode<synchronous>, transform_indices = @transform_1, window_bounds = array<i64: 16, 32>}, {pipeline_mode = #tpu.pipeline_mode<synchronous>, transform_indices = @transform_2, window_bounds = array<i64: 1, 32>}, {pipeline_mode = #tpu.pipeline_mode<synchronous>, transform_indices = @transform_3, window_bounds = array<i64: 32, 32>}, {pipeline_mode = #tpu.pipeline_mode<synchronous>, transform_indices = @transform_4, window_bounds = array<i64: 1, 32>}, {pipeline_mode = #tpu.pipeline_mode<synchronous>, transform_indices = @transform_5, window_bounds = array<i64: 1, 32>}, {pipeline_mode = #tpu.pipeline_mode<synchronous>, transform_indices = @transform_6, window_bounds = array<i64: 1, 1>}, {transform_indices = @transform_7, window_bounds = array<i64: 1, 128>}]} {
    %c0 = arith.constant 0 : index
    %c0_0 = arith.constant 0 : index
    %0 = vector.load %arg1[%c0, %c0_0] : memref<128x16xf32, #tpu.memory_space<vmem>>, vector<128x16xf32>
    %c0_1 = arith.constant 0 : index
    %c0_2 = arith.constant 0 : index
    %1 = vector.load %arg2[%c0_1, %c0_2] : memref<16x32xf32, #tpu.memory_space<vmem>>, vector<16x32xf32>
    %cst = arith.constant dense<0.000000e+00> : vector<128x32xf32>
    %2 = tpu.matmul %0, %1, %cst {dimension_numbers = #tpu.dot_dimension_numbers<[1], [0], [0], [1], [0, 0, 1, 1], [], []>} : vector<128x16xf32>, vector<16x32xf32>, vector<128x32xf32> -> vector<128x32xf32>
    %c0_3 = arith.constant 0 : index
    %c0_4 = arith.constant 0 : index
    %3 = vector.load %arg3[%c0_3, %c0_4] : memref<1x32xf32, #tpu.memory_space<vmem>>, vector<1x32xf32>
    %4 = vector.broadcast %3 : vector<1x32xf32> to vector<128x32xf32>
    %5 = arith.addf %2, %4 : vector<128x32xf32>
    %cst_5 = arith.constant 0.000000e+00 : f32
    %6 = vector.broadcast %cst_5 : f32 to vector<128x32xf32>
    %7 = arith.maximumf %5, %6 : vector<128x32xf32>
    %c0_6 = arith.constant 0 : index
    %c0_7 = arith.constant 0 : index
    %8 = vector.load %arg4[%c0_6, %c0_7] : memref<32x32xf32, #tpu.memory_space<vmem>>, vector<32x32xf32>
    %cst_8 = arith.constant dense<0.000000e+00> : vector<128x32xf32>
    %9 = tpu.matmul %7, %8, %cst_8 {dimension_numbers = #tpu.dot_dimension_numbers<[1], [0], [0], [1], [0, 0, 1, 1], [], []>} : vector<128x32xf32>, vector<32x32xf32>, vector<128x32xf32> -> vector<128x32xf32>
    %c0_9 = arith.constant 0 : index
    %c0_10 = arith.constant 0 : index
    %10 = vector.load %arg5[%c0_9, %c0_10] : memref<1x32xf32, #tpu.memory_space<vmem>>, vector<1x32xf32>
    %11 = vector.broadcast %10 : vector<1x32xf32> to vector<128x32xf32>
    %12 = arith.addf %9, %11 : vector<128x32xf32>
    %cst_11 = arith.constant 0.000000e+00 : f32
    %13 = vector.broadcast %cst_11 : f32 to vector<128x32xf32>
    %14 = arith.maximumf %12, %13 : vector<128x32xf32>
    %c0_12 = arith.constant 0 : index
    %c0_13 = arith.constant 0 : index
    %15 = vector.load %arg6[%c0_12, %c0_13] : memref<1x32xf32, #tpu.memory_space<vmem>>, vector<1x32xf32>
    %cst_14 = arith.constant dense<0.000000e+00> : vector<1x128xf32>
    %16 = tpu.matmul %15, %14, %cst_14 {dimension_numbers = #tpu.dot_dimension_numbers<[1], [1], [0], [0], [0, 0, 1, 0], [], []>} : vector<1x32xf32>, vector<128x32xf32>, vector<1x128xf32> -> vector<1x128xf32>
    %c0_15 = arith.constant 0 : index
    %c0_16 = arith.constant 0 : index
    %17 = vector.load %arg7[%c0_15, %c0_16] : memref<1x1xf32, #tpu.memory_space<vmem>>, vector<1x1xf32>
    %18 = vector.broadcast %17 : vector<1x1xf32> to vector<1x128xf32>
    %19 = arith.addf %16, %18 : vector<1x128xf32>
    %c0_17 = arith.constant 0 : index
    %c0_18 = arith.constant 0 : index
    %20 = vector.load %arg8[%c0_17, %c0_18] : memref<1x128xf32, #tpu.memory_space<vmem>>, vector<1x128xf32>
    tpu.vector_store %arg8[%c0_17, %c0_18], %19 {strides = array<i32>} : memref<1x128xf32, #tpu.memory_space<vmem>>, vector<1x128xf32>,
    return
  }
  func.func @transform_0(%arg0: i32) -> (i32, i32) {
    %c0_i32 = arith.constant 0 : i32
    %c0_i32_0 = arith.constant 0 : i32
    return %arg0, %c0_i32 : i32, i32
  }
  func.func @transform_1(%arg0: i32) -> (i32, i32) {
    %c0_i32 = arith.constant 0 : i32
    %c0_i32_0 = arith.constant 0 : i32
    %c0_i32_1 = arith.constant 0 : i32
    return %c0_i32, %c0_i32_0 : i32, i32
  }
  func.func @transform_2(%arg0: i32) -> (i32, i32) {
    %c0_i32 = arith.constant 0 : i32
    %c0_i32_0 = arith.constant 0 : i32
    %c0_i32_1 = arith.constant 0 : i32
    return %c0_i32, %c0_i32_0 : i32, i32
  }
  func.func @transform_3(%arg0: i32) -> (i32, i32) {
    %c0_i32 = arith.constant 0 : i32
    %c0_i32_0 = arith.constant 0 : i32
    %c0_i32_1 = arith.constant 0 : i32
    return %c0_i32, %c0_i32_0 : i32, i32
  }
  func.func @transform_4(%arg0: i32) -> (i32, i32) {
    %c0_i32 = arith.constant 0 : i32
    %c0_i32_0 = arith.constant 0 : i32
    %c0_i32_1 = arith.constant 0 : i32
    return %c0_i32, %c0_i32_0 : i32, i32
  }
  func.func @transform_5(%arg0: i32) -> (i32, i32) {
    %c0_i32 = arith.constant 0 : i32
    %c0_i32_0 = arith.constant 0 : i32
    %c0_i32_1 = arith.constant 0 : i32
    return %c0_i32, %c0_i32_0 : i32, i32
  }
  func.func @transform_6(%arg0: i32) -> (i32, i32) {
    %c0_i32 = arith.constant 0 : i32
    %c0_i32_0 = arith.constant 0 : i32
    %c0_i32_1 = arith.constant 0 : i32
    return %c0_i32, %c0_i32_0 : i32, i32
  }
  func.func @transform_7(%arg0: i32) -> (i32, i32) {
    %c0_i32 = arith.constant 0 : i32
    %c0_i32_0 = arith.constant 0 : i32
    return %c0_i32, %arg0 : i32, i32
  }
}

</mosaic_0001>

<bundles_post_ra>
// kernel: tpu_custom_call.1
= control target key start
LH: loop header
LB: loop body
LE: loop exit
PB: predicated region body
PF: predicated region fallthrough
CT: control target
= control target key end

     0   :  { %s772_s0 = inlined_call_operand.hbm [shape: f32[8,16], index: 0, kind: input, shape index: {}]   ;;  %s773_s1 = inlined_call_operand.hbm [shape: f32[16,32], index: 1, kind: input, shape index: {}]   ;;  %s774_s2 = inlined_call_operand.vmem [shape: f32[1,32], index: 2, kind: input, shape index: {}]   ;;  %s775_s3 = inlined_call_operand.hbm [shape: f32[32,32], index: 3, kind: input, shape index: {}]   ;;  %s776_s4 = inlined_call_operand.vmem [shape: f32[1,32], index: 4, kind: input, shape index: {}]   ;;  %s777_s5 = inlined_call_operand.vmem [shape: f32[1,32], index: 5, kind: input, shape index: {}]   ;;  %s778_s6 = inlined_call_operand.<no memory space> [shape: f32[1,1], index: 6, kind: input, shape index: {}]   ;;  %s779_s7 = inlined_call_operand.hbm [shape: f32[1,8], index: 7, kind: output, shape index: {}]  }
   0x1   :  { %v12_v0 = vstv %s778_s6 }
   0x2   :  { %13 = vst [vmem:[#allocation2] sm:$0x1] %v12_v0 }
   0x3   :  { %14 = vsyncpa [#allocation4], 0 }
   0x4   :  { %15 = vsyncpa [#allocation7], 0 }
   0x5   :  { %16 = vsyncpa [#allocation5], 0 }
   0x6   :  { %20 = vsyncadd [#allocation4], 1920  ;;  %s34_s28 = sshll.u32 %s773_s1, 4  ;;  %s631_s29 = smov [#allocation6]   ;;  %s35_s28 = int_to_ptr.hbm [resolvable:$true] %s34_s28 }
   0x7   :  { %s36_s30 = sshll.u32 %s631_s29, 4  ;;  %s21_s10 = sshll.u32 %s772_s0, 4  ;;  %s37_s30 = int_to_ptr.vmem [resolvable:$true] %s36_s30  ;;  %s22_s10 = int_to_ptr.hbm [resolvable:$true] %s21_s10 }
   0x8   :  { %s632_s11 = smov 128   ;;  %s633_s12 = smov 8  }
   0x9   :  { %42 = dma.hbm_to_vmem [thread:$0]  %s35_s28, 256, %s37_s30, [#allocation7], %s632_s11, %s632_s11, %s633_s12  }
   0xa   :  { %s634_s6 = smov [#allocation3]   ;;  %s49_s16 = sshll.u32 %s775_s3, 4  ;;  %s50_s16 = int_to_ptr.hbm [resolvable:$true] %s49_s16 }
   0xb   :  { %s23_s13 = sshll.u32 %s634_s6, 4  ;;  %s635_s1 = smov [#allocation8]   ;;  %s24_s13 = int_to_ptr.vmem [resolvable:$true] %s23_s13 }
   0xc   :  { %29 = dma.hbm_to_vmem [thread:$0]  %s22_s10, 128, %s24_s13, [#allocation4], %s632_s11, %s632_s11, %s633_s12  }
   0xd   :  { %s51_s17 = sshll.u32 %s635_s1, 4  ;;  %s52_s17 = int_to_ptr.vmem [resolvable:$true] %s51_s17 }
   0xe   :  { %57 = dma.hbm_to_vmem [thread:$0]  %s50_s16, 512, %s52_s17, [#allocation7], %s632_s11, %s632_s11, %s633_s12  }
   0xf   :  { %625 = dma.done.wait [#allocation4], 2048  }
  0x10   :  { %626 = vsyncadd [#allocation4], 4294965248 }
  0x11   :  { %627 = dma.done.wait [#allocation7], 768  }
  0x12   :  { %628 = vsyncadd [#allocation7], 4294966528  ;;  %v93_v1 = vld [vmem:[#allocation6 + $0x8] sm:$0xff]  ;;  %v92_v2 = vld [vmem:[#allocation6] sm:$0xff]  ;;  %vm98_vm0 = vcmask 130048   ;;  %vm236_vm1 = vcmask 261120  }
  0x13   :  { %161 = vmatpush.msra.mxu0 %v93_v1  ;;  %v76_v3 = vld [vmem:[#allocation3] sm:$0xff]  ;;  %513 = vmatpush.msra.mxu3 %v93_v1  ;;  %v77_v4 = vld [vmem:[#allocation3 + $0x8] sm:$0xff]  ;;  %v78_v5 = vld [vmem:[#allocation3 + $0x10] sm:$0xff]  ;;  %s637_s20 = smov [#allocation9]   ;;  %s453_s24 = sshll.u32 %s779_s7, 4  ;;  %s454_s24 = int_to_ptr.hbm [resolvable:$true] %s453_s24 }
  0x14   :  { %v79_v6 = vld [vmem:[#allocation3 + $0x18] sm:$0xff]  ;;  %v80_v7 = vld [vmem:[#allocation3 + $0x20] sm:$0xff]  ;;  %v81_v8 = vld [vmem:[#allocation3 + $0x28] sm:$0xff]  ;;  %s451_s21 = sshll.u32 %s637_s20, 4  ;;  %s452_s21 = int_to_ptr.vmem [resolvable:$true] %s451_s21 }
  0x15   :  { %162 = vmatpush.msra.mxu0 %v92_v2  ;;  %514 = vmatpush.msra.mxu3 %v92_v2  ;;  %v82_v9 = vld [vmem:[#allocation3 + $0x30] sm:$0xff]  ;;  %v87_v10 = vld [vmem:[#allocation3 + $0x58] sm:$0xff]  ;;  %v231_v11 = vld [vmem:[#allocation8 + $0x18] sm:$0xff] }
  0x16   :  { %464 = vmatmul.msk.f32.vlgmr.msra.gmra.mxu0 %vm98_vm0, %v76_v3  ;;  %475 = vmatmul.msk.f32.vlgmr.msra.gmra.mxu3 %vm98_vm0, %v87_v10  ;;  %v83_v12 = vld [vmem:[#allocation3 + $0x38] sm:$0xff]  ;;  %v88_v13 = vld [vmem:[#allocation3 + $0x60] sm:$0xff]  ;;  %v89_v15 = vld [vmem:[#allocation3 + $0x68] sm:$0xff] }
  0x17   :  { %297 = vmatpush.msra.mxu1 %v231_v11  ;;  %515 = vmatpush.msrb.mxu3 %v231_v11  ;;  %v84_v14 = vld [vmem:[#allocation3 + $0x40] sm:$0xff]  ;;  %v85_v16 = vld [vmem:[#allocation3 + $0x48] sm:$0xff]  ;;  %v90_v17 = vld [vmem:[#allocation3 + $0x70] sm:$0xff] }
  0x18   :  { %v86_v18 = vld [vmem:[#allocation3 + $0x50] sm:$0xff]  ;;  %v91_v19 = vld [vmem:[#allocation3 + $0x78] sm:$0xff]  ;;  %v230_v20 = vld [vmem:[#allocation8 + $0x10] sm:$0xff] }
  0x19   :  { %298 = vmatpush.msra.mxu1 %v230_v20  ;;  %516 = vmatpush.msrb.mxu3 %v230_v20  ;;  %v229_v21 = vld [vmem:[#allocation8 + $0x8] sm:$0xff]  ;;  %v228_v22 = vld [vmem:[#allocation8] sm:$0xff] }
  0x1a   :  { %v709_v23 = vld [vmem:[%s774_s2] ss:$0 sm:$0xff] }
  0x1b   :  { %299 = vmatpush.msra.mxu1 %v229_v21  ;;  %517 = vmatpush.msrb.mxu3 %v229_v21  ;;  %v528_v20 = vld [vmem:[%s776_s4] ss:$0 sm:$0xff] }
  0x1d   :  { %300 = vmatpush.msra.mxu1 %v228_v22  ;;  %518 = vmatpush.msrb.mxu3 %v228_v22 }
  0x1e   :  { %465 = vmatmul.msk.f32.gmra.mxu0 %vm98_vm0, %v77_v4  ;;  %476 = vmatmul.msk.f32.gmra.mxu3 %vm98_vm0, %v88_v13 }
  0x26   :  { %466 = vmatmul.msk.f32.gmra.mxu0 %vm98_vm0, %v78_v5  ;;  %477 = vmatmul.msk.f32.gmra.mxu3 %vm98_vm0, %v89_v15 }
  0x2e   :  { %467 = vmatmul.msk.f32.gmra.mxu0 %vm98_vm0, %v79_v6  ;;  %478 = vmatmul.msk.f32.gmra.mxu3 %vm98_vm0, %v90_v17 }
  0x36   :  { %468 = vmatmul.msk.f32.gmra.mxu0 %vm98_vm0, %v80_v7  ;;  %479 = vmatmul.msk.f32.gmra.mxu3 %vm98_vm0, %v91_v19 }
  0x3e   :  { %469 = vmatmul.msk.f32.gmra.mxu0 %vm98_vm0, %v81_v8 }
  0x46   :  { %470 = vmatmul.msk.f32.gmra.mxu0 %vm98_vm0, %v82_v9 }
  0x4e   :  { %471 = vmatmul.msk.f32.gmra.mxu0 %vm98_vm0, %v83_v12 }
  0x56   :  { %472 = vmatmul.msk.f32.gmra.mxu0 %vm98_vm0, %v84_v14 }
  0x5e   :  { %473 = vmatmul.msk.f32.gmra.mxu0 %vm98_vm0, %v85_v16 }
  0x66   :  { %474 = vmatmul.msk.f32.gmra.mxu0 %vm98_vm0, %v86_v18 }
  0x93   :  { %v164_v24 = vpop.f32.mrf.mxu0 }
  0x94   :  { %v165_v25 = vadd.f32 %v709_v23, %v164_v24 }
  0x96   :  { %v212_v26 = vmax.f32 %v165_v25, 0.0 }
  0x98   :  { %480 = vmatmul.msk.f32.vlgmr.msra.gmra.mxu1 %vm236_vm1, %v212_v26 }
  0x99   :  { %v197_v53 = vpop.f32.mrf.mxu3 }
  0x9a   :  { %v198_v59 = vadd.f32 %v709_v23, %v197_v53 }
  0x9b   :  { %v167_v27 = vpop.f32.mrf.mxu0 }
  0x9c   :  { %v168_v28 = vadd.f32 %v709_v23, %v167_v27  ;;  %v223_v60 = vmax.f32 %v198_v59, 0.0  ;;  %v366_v59 = vld [vmem:[%s777_s5] sm:$0x1] }
  0x9e   :  { %v213_v29 = vmax.f32 %v168_v28, 0.0 }
  0xa0   :  { %481 = vmatmul.msk.f32.gmra.mxu1 %vm236_vm1, %v213_v29 }
  0xa1   :  { %v200_v58 = vpop.f32.mrf.mxu3 }
  0xa2   :  { %v201_v61 = vadd.f32 %v709_v23, %v200_v58 }
  0xa3   :  { %v170_v30 = vpop.f32.mrf.mxu0 }
  0xa4   :  { %v171_v31 = vadd.f32 %v709_v23, %v170_v30  ;;  %v224_v63 = vmax.f32 %v201_v61, 0.0 }
  0xa6   :  { %v214_v32 = vmax.f32 %v171_v31, 0.0 }
  0xa8   :  { %482 = vmatmul.msk.f32.gmra.mxu1 %vm236_vm1, %v214_v32 }
  0xa9   :  { %v203_v62 = vpop.f32.mrf.mxu3 }
  0xaa   :  { %v204_v0 = vadd.f32 %v709_v23, %v203_v62 }
  0xab   :  { %v173_v33 = vpop.f32.mrf.mxu0 }
  0xac   :  { %v174_v34 = vadd.f32 %v709_v23, %v173_v33  ;;  %v225_v2 = vmax.f32 %v204_v0, 0.0 }
  0xae   :  { %v215_v35 = vmax.f32 %v174_v34, 0.0 }
  0xb0   :  { %483 = vmatmul.msk.f32.gmra.mxu1 %vm236_vm1, %v215_v35 }
  0xb1   :  { %v206_v1 = vpop.f32.mrf.mxu3 }
  0xb2   :  { %v207_v3 = vadd.f32 %v709_v23, %v206_v1 }
  0xb3   :  { %v176_v36 = vpop.f32.mrf.mxu0 }
  0xb4   :  { %v177_v37 = vadd.f32 %v709_v23, %v176_v36  ;;  %v226_v4 = vmax.f32 %v207_v3, 0.0 }
  0xb6   :  { %v216_v38 = vmax.f32 %v177_v37, 0.0 }
  0xb8   :  { %484 = vmatmul.msk.f32.gmra.mxu1 %vm236_vm1, %v216_v38 }
  0xb9   :  { %v209_v5 = vpop.f32.mrf.mxu3 }
  0xba   :  { %v210_v6 = vadd.f32 %v709_v23, %v209_v5 }
  0xbb   :  { %v179_v39 = vpop.f32.mrf.mxu0 }
  0xbc   :  { %v180_v40 = vadd.f32 %v709_v23, %v179_v39  ;;  %v227_v7 = vmax.f32 %v210_v6, 0.0 }
  0xbe   :  { %v217_v41 = vmax.f32 %v180_v40, 0.0 }
  0xc0   :  { %485 = vmatmul.msk.f32.gmra.mxu1 %vm236_vm1, %v217_v41 }
  0xc3   :  { %v182_v42 = vpop.f32.mrf.mxu0 }
  0xc4   :  { %v183_v43 = vadd.f32 %v709_v23, %v182_v42 }
  0xc6   :  { %v218_v44 = vmax.f32 %v183_v43, 0.0 }
  0xc8   :  { %486 = vmatmul.msk.f32.gmra.mxu1 %vm236_vm1, %v218_v44  ;;  %v367_v44 = vld [vmem:[#allocation2] sm:$0x1] }
  0xcb   :  { %v185_v45 = vpop.f32.mrf.mxu0 }
  0xcc   :  { %v186_v46 = vadd.f32 %v709_v23, %v185_v45  ;;  %v636_v45 = vmov 0  }
  0xcd   :  { %526 = vset.pattern.permute.xlu0 %v636_v45 }
  0xce   :  { %v219_v47 = vmax.f32 %v186_v46, 0.0  ;;  %370 = vperm.xlu0 %526, %v367_v44  }
  0xd0   :  { %487 = vmatmul.msk.f32.gmra.mxu1 %vm236_vm1, %v219_v47 }
  0xd3   :  { %v188_v48 = vpop.f32.mrf.mxu0 }
  0xd4   :  { %v189_v49 = vadd.f32 %v709_v23, %v188_v48 }
  0xd6   :  { %v220_v50 = vmax.f32 %v189_v49, 0.0 }
  0xd8   :  { %488 = vmatmul.msk.f32.gmra.mxu1 %vm236_vm1, %v220_v50 }
  0xdb   :  { %v191_v51 = vpop.f32.mrf.mxu0 }
  0xdc   :  { %v192_v52 = vadd.f32 %v709_v23, %v191_v51 }
  0xde   :  { %v221_v54 = vmax.f32 %v192_v52, 0.0 }
  0xe0   :  { %489 = vmatmul.msk.f32.gmra.mxu1 %vm236_vm1, %v221_v54 }
  0xe3   :  { %v194_v55 = vpop.f32.mrf.mxu0 }
  0xe4   :  { %v195_v56 = vadd.f32 %v709_v23, %v194_v55 }
  0xe6   :  { %v222_v57 = vmax.f32 %v195_v56, 0.0 }
  0xe8   :  { %490 = vmatmul.msk.f32.vlgmr.msrb.gmra.mxu3 %vm236_vm1, %v222_v57 }
  0xf0   :  { %491 = vmatmul.msk.f32.gmra.mxu3 %vm236_vm1, %v223_v60 }
  0xf8   :  { %492 = vmatmul.msk.f32.gmra.mxu3 %vm236_vm1, %v224_v63 }
 0x100   :  { %493 = vmatmul.msk.f32.gmra.mxu3 %vm236_vm1, %v225_v2 }
 0x108   :  { %494 = vmatmul.msk.f32.gmra.mxu3 %vm236_vm1, %v226_v4 }
 0x110   :  { %495 = vmatmul.msk.f32.gmra.mxu3 %vm236_vm1, %v227_v7 }
 0x115   :  { %v743_v8 = vpop.f32.mrf.mxu1 }
 0x116   :  { %v303_v56 = vadd.f32 %v528_v20, %v743_v8 }
 0x118   :  { %v350_v58 = vmax.f32 %v303_v56, 0.0 }
 0x11d   :  { %v305_v9 = vpop.f32.mrf.mxu1 }
 0x11e   :  { %v306_v54 = vadd.f32 %v528_v20, %v305_v9 }
 0x120   :  { %v351_v57 = vmax.f32 %v306_v54, 0.0 }
 0x125   :  { %v308_v10 = vpop.f32.mrf.mxu1 }
 0x126   :  { %v309_v52 = vadd.f32 %v528_v20, %v308_v10 }
 0x128   :  { %v352_v55 = vmax.f32 %v309_v52, 0.0 }
 0x12d   :  { %v311_v11 = vpop.f32.mrf.mxu1 }
 0x12e   :  { %v312_v50 = vadd.f32 %v528_v20, %v311_v11 }
 0x130   :  { %v353_v53 = vmax.f32 %v312_v50, 0.0 }
 0x135   :  { %v314_v14 = vpop.f32.mrf.mxu1 }
 0x136   :  { %v315_v48 = vadd.f32 %v528_v20, %v314_v14 }
 0x138   :  { %v354_v51 = vmax.f32 %v315_v48, 0.0 }
 0x13d   :  { %v317_v16 = vpop.f32.mrf.mxu1 }
 0x13e   :  { %v318_v46 = vadd.f32 %v528_v20, %v317_v16 }
 0x140   :  { %v355_v49 = vmax.f32 %v318_v46, 0.0  ;;  %v371_v60 = vpop.permute.xlu0 %370 }
 0x141   :  { %v373_v61 = vperm.slane %v371_v60, 0 }
 0x145   :  { %v320_v18 = vpop.f32.mrf.mxu1 }
 0x146   :  { %v321_v42 = vadd.f32 %v528_v20, %v320_v18 }
 0x148   :  { %v356_v47 = vmax.f32 %v321_v42, 0.0 }
 0x14d   :  { %v323_v21 = vpop.f32.mrf.mxu1 }
 0x14e   :  { %v324_v40 = vadd.f32 %v528_v20, %v323_v21 }
 0x150   :  { %v357_v43 = vmax.f32 %v324_v40, 0.0 }
 0x155   :  { %v326_v28 = vpop.f32.mrf.mxu1 }
 0x156   :  { %v327_v38 = vadd.f32 %v528_v20, %v326_v28 }
 0x158   :  { %v358_v41 = vmax.f32 %v327_v38, 0.0 }
 0x15d   :  { %v329_v35 = vpop.f32.mrf.mxu1 }
 0x15e   :  { %v330_v36 = vadd.f32 %v528_v20, %v329_v35 }
 0x160   :  { %v359_v39 = vmax.f32 %v330_v36, 0.0 }
 0x16b   :  { %v332_v12 = vpop.f32.mrf.mxu3 }
 0x16c   :  { %v333_v33 = vadd.f32 %v528_v20, %v332_v12 }
 0x16e   :  { %v360_v37 = vmax.f32 %v333_v33, 0.0 }
 0x173   :  { %v335_v13 = vpop.f32.mrf.mxu3 }
 0x174   :  { %v336_v31 = vadd.f32 %v528_v20, %v335_v13 }
 0x176   :  { %v361_v34 = vmax.f32 %v336_v31, 0.0 }
 0x17b   :  { %v338_v15 = vpop.f32.mrf.mxu3 }
 0x17c   :  { %v339_v29 = vadd.f32 %v528_v20, %v338_v15 }
 0x17e   :  { %v362_v32 = vmax.f32 %v339_v29, 0.0 }
 0x183   :  { %v341_v17 = vpop.f32.mrf.mxu3 }
 0x184   :  { %v342_v26 = vadd.f32 %v528_v20, %v341_v17 }
 0x186   :  { %v363_v30 = vmax.f32 %v342_v26, 0.0 }
 0x18b   :  { %v344_v19 = vpop.f32.mrf.mxu3 }
 0x18c   :  { %v345_v24 = vadd.f32 %v528_v20, %v344_v19 }
 0x18e   :  { %v364_v27 = vmax.f32 %v345_v24, 0.0 }
 0x193   :  { %v347_v22 = vpop.f32.mrf.mxu3 }
 0x194   :  { %v348_v23 = vadd.f32 %v528_v20, %v347_v22 }
 0x196   :  { %v365_v25 = vmax.f32 %v348_v23, 0.0 }
 0x198   :  { %496 = vmatpush.xpose.msk.msra.mxu2 %vm236_vm1, %v365_v25 }
 0x19c   :  { %497 = vmatpush.xpose.msk.msra.mxu2 %vm236_vm1, %v364_v27 }
 0x1a0   :  { %498 = vmatpush.xpose.msk.msra.mxu2 %vm236_vm1, %v363_v30 }
 0x1a4   :  { %499 = vmatpush.xpose.msk.msra.mxu2 %vm236_vm1, %v362_v32 }
 0x1a8   :  { %500 = vmatpush.xpose.msk.msra.mxu2 %vm236_vm1, %v361_v34 }
 0x1ac   :  { %501 = vmatpush.xpose.msk.msra.mxu2 %vm236_vm1, %v360_v37 }
 0x1b0   :  { %502 = vmatpush.xpose.msk.msra.mxu2 %vm236_vm1, %v359_v39 }
 0x1b4   :  { %503 = vmatpush.xpose.msk.msra.mxu2 %vm236_vm1, %v358_v41 }
 0x1b8   :  { %504 = vmatpush.xpose.msk.msra.mxu2 %vm236_vm1, %v357_v43 }
 0x1bc   :  { %505 = vmatpush.xpose.msk.msra.mxu2 %vm236_vm1, %v356_v47 }
 0x1c0   :  { %506 = vmatpush.xpose.msk.msra.mxu2 %vm236_vm1, %v355_v49 }
 0x1c4   :  { %507 = vmatpush.xpose.msk.msra.mxu2 %vm236_vm1, %v354_v51 }
 0x1c8   :  { %508 = vmatpush.xpose.msk.msra.mxu2 %vm236_vm1, %v353_v53 }
 0x1cc   :  { %509 = vmatpush.xpose.msk.msra.mxu2 %vm236_vm1, %v352_v55 }
 0x1d0   :  { %510 = vmatpush.xpose.msk.msra.mxu2 %vm236_vm1, %v351_v57 }
 0x1d4   :  { %511 = vmatpush.xpose.msk.msra.mxu2 %vm236_vm1, %v350_v58 }
 0x1d7   :  { %512 = vmatmul.msk.f32.vlgmr.msra.gmra.mxu2 %vm236_vm1, %v366_v59 }
 0x25a   :  { %v442_v62 = vpop.f32.mrf.mxu2 }
 0x25b   :  { %v443_v63 = vadd.f32 %v442_v62, %v373_v61 }
 0x25d   :  { %445 = vst [vmem:[#allocation9] sm:$0x1] %v443_v63 }
 0x25e   :  { %456 = dma.vmem_to_hbm [thread:$0]  %s452_s21, 16, %s454_s24, [#allocation5]  }
 0x25f   :  { %629 = dma.done.wait [#allocation5], 16  }
 0x260   :  { %630 = vsyncadd [#allocation5], 4294967280 }
 0x261   :  { %461 = vsyncpa [#allocation4], 1 }
 0x262   :  { %462 = vsyncpa [#allocation7], 1 }
 0x263   :  { %463 = vsyncpa [#allocation5], 1 }

</bundles_post_ra>
